<compile_context>
chip_gen: v7x
topology: tpu7x:2x2x1
jax: 0.10.0
libtpu: 0.0.40
codegen_flags: <defaults>
</compile_context>

<pallas_src>
import functools

import jax
import jax.numpy as jnp
from jax.experimental import pallas as pl
from jax.experimental.pallas import tpu as pltpu

# ----------------------------- model hyperparams -----------------------------
N_FEATURES = 32          # fraud-detection feature count
N_TREES    = 8           # T
DEPTH      = 3           # D
N_LEAVES   = 1 << DEPTH  # L = 8
BASE_SCORE = 0.0
THRESHOLD  = 0.5         # decision threshold used by .predict()

BATCH_TILE = 1024        # max rows (lanes) processed per grid step


def _round_up(v, m):
    return (v + m - 1) // m * m


# --------------------------------- kernel ------------------------------------
def _gbdt_kernel(x_ref, sel_ref, thr_ref, leaf_ref, out_ref):
    """One batch tile of the oblivious-GBDT forward pass (batch on lanes).

    x_ref   : [BT, F]      feature tile (rows = samples, natural layout)
    sel_ref : [D*T, F]     one-hot feature selectors (row d*T + t)
    thr_ref : [D*T, 1]     split thresholds (broadcast along lanes)
    leaf_ref: [1, L*T]     leaf values, leaf-major flatten (index = leaf*T + t)
    out_ref : [1, BT]      sigmoid(margin), lane-dense
    """
    x = x_ref[...].astype(jnp.float32)
    sel = sel_ref[...].astype(jnp.float32)

    # selected[s, n] = sum_f sel[s, f] * x[n, f]
    # MXU-native NT contraction (q @ k^T form): batch lands on lanes without
    # any explicit transpose of the input tile.
    selected = jnp.einsum("sf,nf->sn", sel, x,
                          preferred_element_type=jnp.float32)     # [D*T, BT]

    # Comparison bits: 1.0 if feature >= threshold (go right), else 0.0.
    bits = (selected >= thr_ref[...]).astype(jnp.float32)         # [D*T, BT]
    nbits = 1.0 - bits                                            # go-left

    def level(arr, d):
        return arr[d * N_TREES:(d + 1) * N_TREES, :]              # [T, BT]

    # Leaf indicators via a balanced product tree over levels; every multiply
    # is a full-width [T, BT] vreg op.  Ordering matches leaf = sum_d b_d <<
    # (DEPTH-1-d), i.e. level 0 is the most-significant bit.
    prods = [level(nbits, 0), level(bits, 0)]
    for d in range(1, DEPTH):
        prods = [p * t for p in prods
                 for t in (level(nbits, d), level(bits, d))]
    ind = jnp.concatenate(prods, axis=0)                          # [L*T, BT]

    # margin[0, n] = sum_{leaf, t} leaf_value[leaf, t] * indicator[leaf*T+t, n]
    # One small MXU contraction replaces 8 XLU reductions + serial adds.
    margin = jnp.dot(leaf_ref[...].astype(jnp.float32), ind,
                     preferred_element_type=jnp.float32)          # [1, BT]

    out_ref[...] = jax.nn.sigmoid(margin + BASE_SCORE)


# -------------------------------- wrapper ------------------------------------
@functools.partial(jax.jit, static_argnames=("batch_tile",))
def xgb_forward(x, selectors, thresholds, leaf_values, *, batch_tile=BATCH_TILE):
    """Pallas equivalent of XGBoostPytorchWrapper.forward: x [N, F] -> probs [N]."""
    n, f = x.shape
    dt = DEPTH * N_TREES
    lt = N_LEAVES * N_TREES

    # Tile size: multiple of 128 (lane-dense output), shrunk for small batches
    # so they don't over-pad; pad only when the batch is ragged w.r.t. the tile.
    bt = min(batch_tile, _round_up(n, 128))
    n_pad = _round_up(n, bt)
    if n_pad != n:
        x = jnp.pad(x, ((0, n_pad - n), (0, 0)))

    thr_col = thresholds.reshape(dt, 1).astype(jnp.float32)       # [D*T, 1]
    leaf_flat = leaf_values.reshape(1, lt).astype(jnp.float32)    # [1, L*T]

    probs = pl.pallas_call(
        _gbdt_kernel,
        out_shape=jax.ShapeDtypeStruct((1, n_pad), jnp.float32),
        grid_spec=pltpu.PrefetchScalarGridSpec(
            num_scalar_prefetch=0,
            grid=(n_pad // bt,),
            in_specs=[
                pl.BlockSpec((bt, f), lambda i: (i, 0)),
                pl.BlockSpec((dt, f), lambda i: (0, 0)),
                pl.BlockSpec((dt, 1), lambda i: (0, 0)),
                pl.BlockSpec((1, lt), lambda i: (0, 0)),
            ],
            out_specs=pl.BlockSpec((1, bt), lambda i: (0, i)),
        ),
        compiler_params=pltpu.CompilerParams(
            dimension_semantics=("parallel",)),
    )(x, selectors, thr_col, leaf_flat)

    return probs[0, :n]  # matches torch.FloatTensor(preds) shape [N]


def xgb_predict(x, selectors, thresholds, leaf_values, threshold=THRESHOLD):
    """Pallas equivalent of XGBoostPytorchWrapper.predict."""
    probs = xgb_forward(x, selectors, thresholds, leaf_values)
    return (probs >= threshold).astype(jnp.float32)


# -------------------------- deterministic parameters --------------------------
def make_params():
    dt = DEPTH * N_TREES
    # One-hot feature selectors; split feature for (tree t, level d) chosen
    # deterministically: (7*t + 3*d + 1) % N_FEATURES. Row index = d*T + t.
    feat_idx = jnp.array(
        [[(7 * t + 3 * d + 1) % N_FEATURES for t in range(N_TREES)]
         for d in range(DEPTH)], dtype=jnp.int32).reshape(dt)
    selectors = jax.nn.one_hot(feat_idx, N_FEATURES, dtype=jnp.float32)  # [D*T, F]

    # Thresholds in roughly the input range, deterministic.
    thresholds = (jnp.sin(jnp.arange(dt, dtype=jnp.float32) * 0.7)
                  * 0.5).reshape(1, dt)

    # Leaf values (log-odds contributions), deterministic small values.
    leaf_values = (jnp.cos(
        jnp.arange(N_LEAVES * N_TREES, dtype=jnp.float32) * 0.31)
        * 0.25).reshape(N_LEAVES, N_TREES)

    return selectors, thresholds, leaf_values


# ----------------------------- pure-JAX reference -----------------------------
def xgb_forward_ref(x, selectors, thresholds, leaf_values):
    selected = x.astype(jnp.float32) @ selectors.T              # [N, D*T]
    bits = (selected >= thresholds.reshape(1, -1)).astype(jnp.float32)
    n = x.shape[0]
    margin = jnp.full((n,), BASE_SCORE, dtype=jnp.float32)
    for leaf in range(N_LEAVES):
        acc = jnp.ones((n, N_TREES), dtype=jnp.float32)
        for d in range(DEPTH):
            want_right = (leaf >> (DEPTH - 1 - d)) & 1
            bits_d = bits[:, d * N_TREES:(d + 1) * N_TREES]
            acc = acc * (bits_d if want_right else (1.0 - bits_d))
        margin = margin + jnp.sum(acc * leaf_values[leaf][None, :], axis=1)
    return jax.nn.sigmoid(margin)


# ----------------------------------- main -------------------------------------
if __name__ == "__main__":
    key = jax.random.PRNGKey(0)
    selectors, thresholds, leaf_values = make_params()

    # N=300 exercises the ragged/padding path; N=512 exercises the aligned path.
    for N in (300, 512):
        x = jax.random.normal(jax.random.fold_in(key, N),
                              (N, N_FEATURES), dtype=jnp.float32)

        probs = xgb_forward(x, selectors, thresholds, leaf_values)
        probs = jax.block_until_ready(probs)

        ref = xgb_forward_ref(x, selectors, thresholds, leaf_values)
        assert probs.shape == (N,) and probs.dtype == jnp.float32
        assert jnp.allclose(probs, ref, atol=1e-5, rtol=1e-5), (probs, ref)

        # also exercise .predict() path
        hard = jax.block_until_ready(
            xgb_predict(x, selectors, thresholds, leaf_values))
        assert hard.shape == (N,)

    print("KERNEL_OK")
</pallas_src>

<mosaic_0001>
module attributes {stable_mosaic.version = 11 : i64} {
  func.func @_gbdt_kernel(%arg0: i32, %arg1: memref<384x32xf32, #tpu.memory_space<vmem>>, %arg2: memref<24x32xf32, #tpu.memory_space<vmem>>, %arg3: memref<24x1xf32, #tpu.memory_space<vmem>>, %arg4: memref<1x64xf32, #tpu.memory_space<vmem>>, %arg5: memref<1x384xf32, #tpu.memory_space<vmem>>) attributes {dimension_semantics = [#tpu.dimension_semantics<parallel>], iteration_bounds = array<i64: 1>, scalar_prefetch = 0 : i64, scratch_operands = 0 : i64, tpu.core_type = #tpu.core_type<tc>, window_params = [{transform_indices = @transform_0, window_bounds = array<i64: 384, 32>}, {pipeline_mode = #tpu.pipeline_mode<synchronous>, transform_indices = @transform_1, window_bounds = array<i64: 24, 32>}, {pipeline_mode = #tpu.pipeline_mode<synchronous>, transform_indices = @transform_2, window_bounds = array<i64: 24, 1>}, {pipeline_mode = #tpu.pipeline_mode<synchronous>, transform_indices = @transform_3, window_bounds = array<i64: 1, 64>}, {transform_indices = @transform_4, window_bounds = array<i64: 1, 384>}]} {
    %c0 = arith.constant 0 : index
    %c0_0 = arith.constant 0 : index
    %0 = vector.load %arg1[%c0, %c0_0] : memref<384x32xf32, #tpu.memory_space<vmem>>, vector<384x32xf32>
    %c0_1 = arith.constant 0 : index
    %c0_2 = arith.constant 0 : index
    %1 = vector.load %arg2[%c0_1, %c0_2] : memref<24x32xf32, #tpu.memory_space<vmem>>, vector<24x32xf32>
    "tpu.trace_start"() <{level = 10 : i32, message = "sf,nf->sn"}> : () -> ()
    %cst = arith.constant dense<0.000000e+00> : vector<24x384xf32>
    %2 = tpu.matmul %1, %0, %cst {dimension_numbers = #tpu.dot_dimension_numbers<[1], [1], [0], [0], [0, 0, 1, 0], [], []>} : vector<24x32xf32>, vector<384x32xf32>, vector<24x384xf32> -> vector<24x384xf32>
    "tpu.trace_stop"() : () -> ()
    %c0_3 = arith.constant 0 : index
    %c0_4 = arith.constant 0 : index
    %3 = vector.load %arg3[%c0_3, %c0_4] : memref<24x1xf32, #tpu.memory_space<vmem>>, vector<24x1xf32>
    %4 = vector.broadcast %3 : vector<24x1xf32> to vector<24x384xf32>
    %5 = arith.cmpf oge, %2, %4 : vector<24x384xf32>
    %6 = arith.extui %5 : vector<24x384xi1> to vector<24x384xi32>
    %7 = arith.sitofp %6 : vector<24x384xi32> to vector<24x384xf32>
    %cst_5 = arith.constant 1.000000e+00 : f32
    %8 = vector.broadcast %cst_5 : f32 to vector<24x384xf32>
    %9 = arith.subf %8, %7 : vector<24x384xf32>
    %10 = vector.extract_strided_slice %9 {offsets = [0, 0], sizes = [8, 384], strides = [1, 1]} : vector<24x384xf32> to vector<8x384xf32>
    %11 = vector.extract_strided_slice %7 {offsets = [0, 0], sizes = [8, 384], strides = [1, 1]} : vector<24x384xf32> to vector<8x384xf32>
    %12 = vector.extract_strided_slice %9 {offsets = [8, 0], sizes = [8, 384], strides = [1, 1]} : vector<24x384xf32> to vector<8x384xf32>
    %13 = vector.extract_strided_slice %7 {offsets = [8, 0], sizes = [8, 384], strides = [1, 1]} : vector<24x384xf32> to vector<8x384xf32>
    %14 = arith.mulf %10, %12 : vector<8x384xf32>
    %15 = arith.mulf %10, %13 : vector<8x384xf32>
    %16 = vector.extract_strided_slice %9 {offsets = [8, 0], sizes = [8, 384], strides = [1, 1]} : vector<24x384xf32> to vector<8x384xf32>
    %17 = vector.extract_strided_slice %7 {offsets = [8, 0], sizes = [8, 384], strides = [1, 1]} : vector<24x384xf32> to vector<8x384xf32>
    %18 = arith.mulf %11, %16 : vector<8x384xf32>
    %19 = arith.mulf %11, %17 : vector<8x384xf32>
    %20 = vector.extract_strided_slice %9 {offsets = [16, 0], sizes = [8, 384], strides = [1, 1]} : vector<24x384xf32> to vector<8x384xf32>
    %21 = vector.extract_strided_slice %7 {offsets = [16, 0], sizes = [8, 384], strides = [1, 1]} : vector<24x384xf32> to vector<8x384xf32>
    %22 = arith.mulf %14, %20 : vector<8x384xf32>
    %23 = arith.mulf %14, %21 : vector<8x384xf32>
    %24 = vector.extract_strided_slice %9 {offsets = [16, 0], sizes = [8, 384], strides = [1, 1]} : vector<24x384xf32> to vector<8x384xf32>
    %25 = vector.extract_strided_slice %7 {offsets = [16, 0], sizes = [8, 384], strides = [1, 1]} : vector<24x384xf32> to vector<8x384xf32>
    %26 = arith.mulf %15, %24 : vector<8x384xf32>
    %27 = arith.mulf %15, %25 : vector<8x384xf32>
    %28 = vector.extract_strided_slice %9 {offsets = [16, 0], sizes = [8, 384], strides = [1, 1]} : vector<24x384xf32> to vector<8x384xf32>
    %29 = vector.extract_strided_slice %7 {offsets = [16, 0], sizes = [8, 384], strides = [1, 1]} : vector<24x384xf32> to vector<8x384xf32>
    %30 = arith.mulf %18, %28 : vector<8x384xf32>
    %31 = arith.mulf %18, %29 : vector<8x384xf32>
    %32 = vector.extract_strided_slice %9 {offsets = [16, 0], sizes = [8, 384], strides = [1, 1]} : vector<24x384xf32> to vector<8x384xf32>
    %33 = vector.extract_strided_slice %7 {offsets = [16, 0], sizes = [8, 384], strides = [1, 1]} : vector<24x384xf32> to vector<8x384xf32>
    %34 = arith.mulf %19, %32 : vector<8x384xf32>
    %35 = arith.mulf %19, %33 : vector<8x384xf32>
    %36 = tpu.concatenate %22, %23, %26, %27, %30, %31, %34, %35 in 0 : vector<8x384xf32>, vector<8x384xf32>, vector<8x384xf32>, vector<8x384xf32>, vector<8x384xf32>, vector<8x384xf32>, vector<8x384xf32>, vector<8x384xf32> -> vector<64x384xf32>
    %c0_6 = arith.constant 0 : index
    %c0_7 = arith.constant 0 : index
    %37 = vector.load %arg4[%c0_6, %c0_7] : memref<1x64xf32, #tpu.memory_space<vmem>>, vector<1x64xf32>
    %cst_8 = arith.constant dense<0.000000e+00> : vector<1x384xf32>
    %38 = tpu.matmul %37, %36, %cst_8 {dimension_numbers = #tpu.dot_dimension_numbers<[1], [0], [0], [1], [0, 0, 1, 1], [], []>} : vector<1x64xf32>, vector<64x384xf32>, vector<1x384xf32> -> vector<1x384xf32>
    %cst_9 = arith.constant 0.000000e+00 : f32
    %39 = vector.broadcast %cst_9 : f32 to vector<1x384xf32>
    %40 = arith.addf %38, %39 : vector<1x384xf32>
    %41 = arith.negf %40 : vector<1x384xf32>
    %42 = math.exp %41 : vector<1x384xf32>
    %cst_10 = arith.constant 1.000000e+00 : f32
    %43 = vector.broadcast %cst_10 : f32 to vector<1x384xf32>
    %44 = arith.addf %43, %42 : vector<1x384xf32>
    %45 = arith.divf %43, %44 : vector<1x384xf32>
    %c0_11 = arith.constant 0 : index
    %c0_12 = arith.constant 0 : index
    %46 = vector.load %arg5[%c0_11, %c0_12] : memref<1x384xf32, #tpu.memory_space<vmem>>, vector<1x384xf32>
    tpu.vector_store %arg5[%c0_11, %c0_12], %45 {strides = array<i32>} : memref<1x384xf32, #tpu.memory_space<vmem>>, vector<1x384xf32>,
    return
  }
  func.func @transform_0(%arg0: i32) -> (i32, i32) {
    %c0_i32 = arith.constant 0 : i32
    %c0_i32_0 = arith.constant 0 : i32
    return %arg0, %c0_i32 : i32, i32
  }
  func.func @transform_1(%arg0: i32) -> (i32, i32) {
    %c0_i32 = arith.constant 0 : i32
    %c0_i32_0 = arith.constant 0 : i32
    %c0_i32_1 = arith.constant 0 : i32
    return %c0_i32, %c0_i32_0 : i32, i32
  }
  func.func @transform_2(%arg0: i32) -> (i32, i32) {
    %c0_i32 = arith.constant 0 : i32
    %c0_i32_0 = arith.constant 0 : i32
    %c0_i32_1 = arith.constant 0 : i32
    return %c0_i32, %c0_i32_0 : i32, i32
  }
  func.func @transform_3(%arg0: i32) -> (i32, i32) {
    %c0_i32 = arith.constant 0 : i32
    %c0_i32_0 = arith.constant 0 : i32
    %c0_i32_1 = arith.constant 0 : i32
    return %c0_i32, %c0_i32_0 : i32, i32
  }
  func.func @transform_4(%arg0: i32) -> (i32, i32) {
    %c0_i32 = arith.constant 0 : i32
    %c0_i32_0 = arith.constant 0 : i32
    return %c0_i32, %arg0 : i32, i32
  }
}

</mosaic_0001>

<bundles_post_ra>
// kernel: xgb_forward.1
= control target key start
LH: loop header
LB: loop body
LE: loop exit
PB: predicated region body
PF: predicated region fallthrough
CT: control target
= control target key end

     0   :  { %vm68_vm0 = vcmask 261120   ;;  %v996_v0 = vmov 0.0|0.0   ;;  %vm997_vm2 = vmmov 0   ;;  %v998_v4 = vmov 0.0   ;;  %s1292_s0 = inlined_call_operand.vmem [shape: f32[384,32], index: 0, kind: input, shape index: {}]   ;;  %s1293_s1 = inlined_call_operand.vmem [shape: f32[24,32], index: 1, kind: input, shape index: {}]   ;;  %s1294_s2 = inlined_call_operand.vmem [shape: f32[24,1], index: 2, kind: input, shape index: {}]   ;;  %s1295_s3 = inlined_call_operand.vmem [shape: f32[1,64], index: 3, kind: input, shape index: {}]   ;;  %s1296_s4 = inlined_call_operand.vmem [shape: f32[1,384], index: 4, kind: output, shape index: {}]  }
   0x1   :  { %917 = vmatprep.subr.bf16.mxu1 %v996_v0  ;;  %v33_v1 = vld [vmem:[%s1292_s0 + $0x80] sm:$0xff]  ;;  %v34_v2 = vld [vmem:[%s1292_s0 + $0x88] sm:$0xff]  ;;  %vm1035_vm1 = vmpackc.low %vm68_vm0, %vm68_vm0  ;;  %841 = vmatprep.mubr.msk.f32.mxu1 %vm997_vm2, %v998_v4  ;;  %v999_v9 = vmov 0   ;;  %vm476_vm12 = vcmask 523264  }
   0x2   :  { %v869_v5 = vpack.c.bf16 %v34_v2, %v33_v1  ;;  %v49_v6 = vld [vmem:[%s1292_s0 + $0x100] sm:$0xff]  ;;  %v50_v7 = vld [vmem:[%s1292_s0 + $0x108] sm:$0xff]  ;;  %982 = vset.pattern.permute.xlu0 %v999_v9  ;;  %983 = vset.pattern.permute.xlu1 %v999_v9  ;;  %v35_v12 = vld [vmem:[%s1292_s0 + $0x90] sm:$0xff] }
   0x3   :  { %v17_v8 = vld [vmem:[%s1292_s0] sm:$0xff]  ;;  %v918_v10 = vpack.c.bf16 %v50_v7, %v49_v6  ;;  %v18_v11 = vld [vmem:[%s1292_s0 + $0x8] sm:$0xff]  ;;  %v36_v13 = vld [vmem:[%s1292_s0 + $0x98] sm:$0xff] }
   0x4   :  { %871 = vmatprep.subr.msk.bf16.mxu0 %vm1035_vm1, %v869_v5  ;;  %v872_v14 = vpack.c.bf16 %v18_v11, %v17_v8  ;;  %v875_v15 = vpack.c.bf16 %v36_v13, %v35_v12  ;;  %v51_v16 = vld [vmem:[%s1292_s0 + $0x110] sm:$0xff]  ;;  %v52_v17 = vld [vmem:[%s1292_s0 + $0x118] sm:$0xff]  ;;  %v37_v20 = vld [vmem:[%s1292_s0 + $0xa0] sm:$0xff] }
   0x5   :  { %920 = vmatpush3.bf16.xpose.msk.msra.mxu1 %vm1035_vm1, %v918_v10  ;;  %v19_v18 = vld [vmem:[%s1292_s0 + $0x10] sm:$0xff]  ;;  %v20_v19 = vld [vmem:[%s1292_s0 + $0x18] sm:$0xff]  ;;  %v38_v21 = vld [vmem:[%s1292_s0 + $0xa8] sm:$0xff]  ;;  %v922_v22 = vpack.c.bf16 %v52_v17, %v51_v16 }
   0x6   :  { %874 = vmatpush3.bf16.xpose.msk.msra.mxu0 %vm1035_vm1, %v872_v14  ;;  %921 = vmatprep.subr.bf16.mxu1 %v996_v0  ;;  %v878_v23 = vpack.c.bf16 %v20_v19, %v19_v18  ;;  %v881_v24 = vpack.c.bf16 %v38_v21, %v37_v20  ;;  %v53_v25 = vld [vmem:[%s1292_s0 + $0x120] sm:$0xff]  ;;  %v54_v26 = vld [vmem:[%s1292_s0 + $0x128] sm:$0xff]  ;;  %v39_v29 = vld [vmem:[%s1292_s0 + $0xb0] sm:$0xff] }
   0x7   :  { %877 = vmatprep.subr.msk.bf16.mxu0 %vm1035_vm1, %v875_v15  ;;  %v21_v27 = vld [vmem:[%s1292_s0 + $0x20] sm:$0xff]  ;;  %v22_v28 = vld [vmem:[%s1292_s0 + $0x28] sm:$0xff]  ;;  %v40_v30 = vld [vmem:[%s1292_s0 + $0xb8] sm:$0xff]  ;;  %v926_v31 = vpack.c.bf16 %v54_v26, %v53_v25 }
   0x8   :  { %v1114_v32 = vld [vmem:[%s1293_s1] sm:$0xff]  ;;  %v884_v33 = vpack.c.bf16 %v22_v28, %v21_v27  ;;  %v887_v35 = vpack.c.bf16 %v40_v30, %v39_v29  ;;  %v387_v36 = vld [vmem:[%s1294_s2 + $0x10] sm:$0xff]  ;;  %v386_v37 = vld [vmem:[%s1294_s2 + $0x8] sm:$0xff] }
   0x9   :  { %775 = vmatprep.mubr.msk.f32.mxu0 %vm68_vm0, %v1114_v32  ;;  %v385_v34 = vld [vmem:[%s1294_s2] sm:$0xff]  ;;  %400 = vperm.xlu1 %983, %v387_v36   ;;  %v55_v38 = vld [vmem:[%s1292_s0 + $0x130] sm:$0xff]  ;;  %v56_v39 = vld [vmem:[%s1292_s0 + $0x138] sm:$0xff] }
   0xa   :  { %390 = vperm.xlu0 %982, %v385_v34   ;;  %v23_v40 = vld [vmem:[%s1292_s0 + $0x30] sm:$0xff]  ;;  %v24_v41 = vld [vmem:[%s1292_s0 + $0x38] sm:$0xff]  ;;  %v41_v42 = vld [vmem:[%s1292_s0 + $0xc0] sm:$0xff]  ;;  %v930_v44 = vpack.c.bf16 %v56_v39, %v55_v38 }
   0xb   :  { %v42_v43 = vld [vmem:[%s1292_s0 + $0xc8] sm:$0xff]  ;;  %v890_v45 = vpack.c.bf16 %v24_v41, %v23_v40  ;;  %v57_v47 = vld [vmem:[%s1292_s0 + $0x140] sm:$0xff]  ;;  %v43_v51 = vld [vmem:[%s1292_s0 + $0xd0] sm:$0xff] }
   0xc   :  { %v893_v46 = vpack.c.bf16 %v42_v43, %v41_v42  ;;  %v58_v48 = vld [vmem:[%s1292_s0 + $0x148] sm:$0xff]  ;;  %v25_v49 = vld [vmem:[%s1292_s0 + $0x40] sm:$0xff]  ;;  %v44_v52 = vld [vmem:[%s1292_s0 + $0xd8] sm:$0xff] }
   0xd   :  { %924 = vmatpush3.bf16.xpose.msk.msra.mxu1 %vm1035_vm1, %v922_v22  ;;  %v26_v50 = vld [vmem:[%s1292_s0 + $0x48] sm:$0xff]  ;;  %v934_v53 = vpack.c.bf16 %v58_v48, %v57_v47  ;;  %v899_v55 = vpack.c.bf16 %v44_v52, %v43_v51  ;;  %v59_v56 = vld [vmem:[%s1292_s0 + $0x150] sm:$0xff]  ;;  %v60_v57 = vld [vmem:[%s1292_s0 + $0x158] sm:$0xff] }
   0xe   :  { %880 = vmatpush3.bf16.xpose.msk.msra.mxu0 %vm1035_vm1, %v878_v23  ;;  %925 = vmatprep.subr.bf16.mxu1 %v996_v0  ;;  %v896_v54 = vpack.c.bf16 %v26_v50, %v25_v49  ;;  %v27_v58 = vld [vmem:[%s1292_s0 + $0x50] sm:$0xff]  ;;  %v28_v59 = vld [vmem:[%s1292_s0 + $0x58] sm:$0xff]  ;;  %v45_v60 = vld [vmem:[%s1292_s0 + $0xe0] sm:$0xff]  ;;  %v938_v62 = vpack.c.bf16 %v60_v57, %v59_v56 }
   0xf   :  { %883 = vmatprep.subr.msk.bf16.mxu0 %vm1035_vm1, %v881_v24  ;;  %395 = vperm.xlu0 %982, %v386_v37   ;;  %v46_v61 = vld [vmem:[%s1292_s0 + $0xe8] sm:$0xff]  ;;  %v902_v63 = vpack.c.bf16 %v28_v59, %v27_v58  ;;  %v61_v2 = vld [vmem:[%s1292_s0 + $0x160] sm:$0xff]  ;;  %v47_v8 = vld [vmem:[%s1292_s0 + $0xf0] sm:$0xff] }
  0x10   :  { %v905_v1 = vpack.c.bf16 %v46_v61, %v45_v60  ;;  %v62_v5 = vld [vmem:[%s1292_s0 + $0x168] sm:$0xff]  ;;  %v29_v6 = vld [vmem:[%s1292_s0 + $0x60] sm:$0xff]  ;;  %v48_v9 = vld [vmem:[%s1292_s0 + $0xf8] sm:$0xff] }
  0x11   :  { %v30_v7 = vld [vmem:[%s1292_s0 + $0x68] sm:$0xff]  ;;  %v942_v10 = vpack.c.bf16 %v62_v5, %v61_v2  ;;  %v911_v12 = vpack.c.bf16 %v48_v9, %v47_v8  ;;  %v63_v13 = vld [vmem:[%s1292_s0 + $0x170] sm:$0xff]  ;;  %v64_v14 = vld [vmem:[%s1292_s0 + $0x178] sm:$0xff] }
  0x12   :  { %v908_v11 = vpack.c.bf16 %v30_v7, %v29_v6  ;;  %v31_v15 = vld [vmem:[%s1292_s0 + $0x70] sm:$0xff]  ;;  %v32_v16 = vld [vmem:[%s1292_s0 + $0x78] sm:$0xff]  ;;  %v946_v17 = vpack.c.bf16 %v64_v14, %v63_v13  ;;  %v66_v19 = vld [vmem:[%s1293_s1 + $0x8] sm:$0xff] }
  0x13   :  { %v914_v18 = vpack.c.bf16 %v32_v16, %v31_v15  ;;  %v67_v3 = vld [vmem:[%s1293_s1 + $0x10] sm:$0xff] }
  0x15   :  { %928 = vmatpush3.bf16.xpose.msk.msra.mxu1 %vm1035_vm1, %v926_v31 }
  0x16   :  { %886 = vmatpush3.bf16.xpose.msk.msra.mxu0 %vm1035_vm1, %v884_v33  ;;  %929 = vmatprep.subr.bf16.mxu1 %v996_v0 }
  0x17   :  { %889 = vmatprep.subr.msk.bf16.mxu0 %vm1035_vm1, %v887_v35 }
  0x1d   :  { %932 = vmatpush3.bf16.xpose.msk.msra.mxu1 %vm1035_vm1, %v930_v44 }
  0x1e   :  { %892 = vmatpush3.bf16.xpose.msk.msra.mxu0 %vm1035_vm1, %v890_v45  ;;  %933 = vmatprep.subr.bf16.mxu1 %v996_v0 }
  0x1f   :  { %895 = vmatprep.subr.msk.bf16.mxu0 %vm1035_vm1, %v893_v46 }
  0x25   :  { %936 = vmatpush3.bf16.xpose.msk.msra.mxu1 %vm1035_vm1, %v934_v53 }
  0x26   :  { %898 = vmatpush3.bf16.xpose.msk.msra.mxu0 %vm1035_vm1, %v896_v54  ;;  %937 = vmatprep.subr.bf16.mxu1 %v996_v0 }
  0x27   :  { %901 = vmatprep.subr.msk.bf16.mxu0 %vm1035_vm1, %v899_v55 }
  0x2d   :  { %940 = vmatpush3.bf16.xpose.msk.msra.mxu1 %vm1035_vm1, %v938_v62 }
  0x2e   :  { %904 = vmatpush3.bf16.xpose.msk.msra.mxu0 %vm1035_vm1, %v902_v63  ;;  %941 = vmatprep.subr.bf16.mxu1 %v996_v0 }
  0x2f   :  { %907 = vmatprep.subr.msk.bf16.mxu0 %vm1035_vm1, %v905_v1 }
  0x35   :  { %944 = vmatpush3.bf16.xpose.msk.msra.mxu1 %vm1035_vm1, %v942_v10 }
  0x36   :  { %910 = vmatpush3.bf16.xpose.msk.msra.mxu0 %vm1035_vm1, %v908_v11  ;;  %945 = vmatprep.subr.bf16.mxu1 %v996_v0 }
  0x37   :  { %913 = vmatprep.subr.msk.bf16.mxu0 %vm1035_vm1, %v911_v12 }
  0x3d   :  { %948 = vmatpush3.bf16.xpose.msk.msra.mxu1 %vm1035_vm1, %v946_v17 }
  0x3e   :  { %916 = vmatpush3.bf16.xpose.msk.msra.mxu0 %vm1035_vm1, %v914_v18  ;;  %965 = vmatprep.subr.bf16.mxu1 %v996_v0 }
  0x44   :  { %842 = vmatmul.mubr.msk.f32.vlgmr.msra.gmra.mrb[0].mxu1 %vm68_vm0, %v1114_v32 }
  0x45   :  { %776 = vmatmul.mubr.msk.f32.vlgmr.msra.gmra.mrb[0].mxu0 %vm68_vm0, %v1114_v32  ;;  %844 = vmatprep.mubr.msk.f32.mxu1 %vm997_vm2, %v998_v4 }
  0x46   :  { %777 = vmatprep.mubr.msk.f32.mxu0 %vm68_vm0, %v66_v19 }
  0x48   :  { %845 = vmatmul.mubr.msk.f32.gmra.mrb[2].mxu1 %vm68_vm0, %v66_v19 }
  0x49   :  { %778 = vmatmul.mubr.msk.f32.gmra.mrb[2].mxu0 %vm68_vm0, %v66_v19  ;;  %847 = vmatprep.mubr.msk.f32.mxu1 %vm997_vm2, %v998_v4 }
  0x4a   :  { %779 = vmatprep.mubr.msk.f32.mxu0 %vm68_vm0, %v67_v3 }
  0x4c   :  { %848 = vmatmul.mubr.msk.f32.gmra.mrb[4].mxu1 %vm68_vm0, %v67_v3 }
  0x4d   :  { %780 = vmatmul.mubr.msk.f32.gmra.mrb[4].mxu0 %vm68_vm0, %v67_v3  ;;  %866 = vmatprep.mubr.msk.f32.mxu1 %vm997_vm2, %v998_v4 }
  0x4e   :  { %544 = vmatprep.mubr.f32.mxu0 %v998_v4 }
  0x88   :  { %v401_v37 = vpop.permute.xlu1 %400 }
  0x89   :  { %v391_v20 = vpop.permute.xlu0 %390 }
  0x8e   :  { %v396_v26 = vpop.permute.xlu0 %395 }
 0x117   :  { %v371_v21 = vpop.f32.mrb[0].mxu1 }
 0x118   :  { %v288_v22 = vpop.f32.mrb[0].mxu0  ;;  %vm405_vm3 = vcmp.ge.f32.partialorder %v371_v21, %v391_v20  ;;  %v843_v23 = vpop.f32.mrb[1].mxu1 }
 0x119   :  { %vm403_vm4 = vcmp.ge.f32.partialorder %v288_v22, %v391_v20  ;;  %v290_v24 = vpop.f32.mrb[1].mxu0  ;;  %v731_v25 = vsel %vm405_vm3, 1.0, %v998_v4 }
 0x11a   :  { %v729_v27 = vsel %vm403_vm4, 1.0, %v998_v4  ;;  %vm404_vm5 = vcmp.ge.f32.partialorder %v290_v24, %v391_v20  ;;  %v432_v28 = vsub.f32 1.0, %v731_v25 }
 0x11b   :  { %v730_v29 = vsel %vm404_vm5, 1.0, %v998_v4  ;;  %v376_v30 = vpop.f32.mrb[2].mxu1  ;;  %v430_v33 = vsub.f32 1.0, %v729_v27 }
 0x11c   :  { %vm408_vm6 = vcmp.ge.f32.partialorder %v376_v30, %v396_v26  ;;  %v294_v31 = vpop.f32.mrb[2].mxu0  ;;  %v846_v32 = vpop.f32.mrb[3].mxu1  ;;  %v431_v34 = vsub.f32 1.0, %v730_v29 }
 0x11d   :  { %v734_v35 = vsel %vm408_vm6, 1.0, %v998_v4  ;;  %vm406_vm7 = vcmp.ge.f32.partialorder %v294_v31, %v396_v26  ;;  %v296_v36 = vpop.f32.mrb[3].mxu0 }
 0x11e   :  { %v435_v38 = vsub.f32 1.0, %v734_v35  ;;  %v444_v39 = vmul.f32 %v734_v35, %v432_v28  ;;  %v450_v40 = vmul.f32 %v734_v35, %v731_v25  ;;  %v732_v41 = vsel %vm406_vm7, 1.0, %v998_v4 }
 0x11f   :  { %v433_v42 = vsub.f32 1.0, %v732_v41  ;;  %v442_v43 = vmul.f32 %v732_v41, %v430_v33  ;;  %v448_v44 = vmul.f32 %v732_v41, %v729_v27  ;;  %vm407_vm8 = vcmp.ge.f32.partialorder %v296_v36, %v396_v26  ;;  %v381_v45 = vpop.f32.mrb[4].mxu1 }
 0x120   :  { %v441_v46 = vmul.f32 %v435_v38, %v432_v28  ;;  %v447_v47 = vmul.f32 %v731_v25, %v435_v38  ;;  %v733_v48 = vsel %vm407_vm8, 1.0, %v998_v4  ;;  %vm411_vm9 = vcmp.ge.f32.partialorder %v381_v45, %v401_v37  ;;  %v300_v49 = vpop.f32.mrb[4].mxu0  ;;  %v849_v50 = vpop.f32.mrb[5].mxu1  ;;  %v475_v38 = vld [vmem:[%s1295_s3] sm:$0x1] }
 0x121   :  { %v439_v51 = vmul.f32 %v433_v42, %v430_v33  ;;  %v445_v52 = vmul.f32 %v729_v27, %v433_v42  ;;  %v434_v53 = vsub.f32 1.0, %v733_v48  ;;  %v443_v54 = vmul.f32 %v733_v48, %v431_v34  ;;  %v302_v55 = vpop.f32.mrb[5].mxu0 }
 0x122   :  { %v449_v56 = vmul.f32 %v733_v48, %v730_v29  ;;  %v737_v57 = vsel %vm411_vm9, 1.0, %v998_v4  ;;  %vm409_vm10 = vcmp.ge.f32.partialorder %v300_v49, %v401_v37  ;;  %vm410_vm11 = vcmp.ge.f32.partialorder %v302_v55, %v401_v37 }
 0x123   :  { %v440_v58 = vmul.f32 %v434_v53, %v431_v34  ;;  %v446_v59 = vmul.f32 %v730_v29, %v434_v53  ;;  %v438_v60 = vsub.f32 1.0, %v737_v57  ;;  %v456_v61 = vmul.f32 %v737_v57, %v441_v46 }
 0x124   :  { %v462_v62 = vmul.f32 %v737_v57, %v444_v39  ;;  %v468_v63 = vmul.f32 %v737_v57, %v447_v47  ;;  %v474_v1 = vmul.f32 %v737_v57, %v450_v40  ;;  %v735_v2 = vsel %vm409_vm10, 1.0, %v998_v4 }
 0x125   :  { %v436_v5 = vsub.f32 1.0, %v735_v2  ;;  %v454_v6 = vmul.f32 %v735_v2, %v439_v51  ;;  %v460_v7 = vmul.f32 %v735_v2, %v442_v43  ;;  %v466_v8 = vmul.f32 %v735_v2, %v445_v52 }
 0x126   :  { %v472_v9 = vmul.f32 %v735_v2, %v448_v44  ;;  %v736_v10 = vsel %vm410_vm11, 1.0, %v998_v4  ;;  %v453_v11 = vmul.f32 %v441_v46, %v438_v60  ;;  %v459_v12 = vmul.f32 %v444_v39, %v438_v60 }
 0x127   :  { %v437_v13 = vsub.f32 1.0, %v736_v10  ;;  %v455_v14 = vmul.f32 %v736_v10, %v440_v58  ;;  %v451_v15 = vmul.f32 %v439_v51, %v436_v5  ;;  %v461_v16 = vmul.f32 %v736_v10, %v443_v54 }
 0x128   :  { %v966_v17 = vpack.c.bf16 %v456_v61, %v453_v11  ;;  %v969_v18 = vpack.c.bf16 %v462_v62, %v459_v12  ;;  %v457_v19 = vmul.f32 %v442_v43, %v436_v5  ;;  %v467_v3 = vmul.f32 %v736_v10, %v446_v59 }
 0x129   :  { %v452_v20 = vmul.f32 %v440_v58, %v437_v13  ;;  %v951_v21 = vpack.c.bf16 %v454_v6, %v451_v15  ;;  %v458_v22 = vmul.f32 %v443_v54, %v437_v13  ;;  %v464_v23 = vmul.f32 %v446_v59, %v437_v13 }
 0x12a   :  { %967 = vmatpush3.bf16.msra.mxu1 %v966_v17  ;;  %v955_v24 = vpack.c.bf16 %v460_v7, %v457_v19  ;;  %v465_v25 = vmul.f32 %v447_v47, %v438_v60  ;;  %v463_v26 = vmul.f32 %v445_v52, %v436_v5  ;;  %v470_v27 = vmul.f32 %v449_v56, %v437_v13 }
 0x12b   :  { %v949_v4 = vpack.c.bf16 %v455_v14, %v452_v20  ;;  %968 = vmatprep.subr.bf16.mxu1 %v996_v0  ;;  %v953_v28 = vpack.c.bf16 %v461_v16, %v458_v22  ;;  %v957_v29 = vpack.c.bf16 %v467_v3, %v464_v23  ;;  %v473_v30 = vmul.f32 %v736_v10, %v449_v56 }
 0x12c   :  { %v972_v31 = vpack.c.bf16 %v468_v63, %v465_v25  ;;  %v959_v32 = vpack.c.bf16 %v466_v8, %v463_v26  ;;  %v471_v33 = vmul.f32 %v450_v40, %v438_v60  ;;  %v469_v34 = vmul.f32 %v448_v44, %v436_v5 }
 0x12d   :  { %950 = vmatprep.subr.bf16.mxu0 %v949_v4  ;;  %v961_v35 = vpack.c.bf16 %v473_v30, %v470_v27  ;;  %v1000_v51 = vmov 1966171168   ;;  %v646_v53 = vlaneseq }
 0x12e   :  { %952 = vmatpush1.bf16.msra.mxu0 %v951_v21  ;;  %970 = vmatpush3.bf16.msra.mxu1 %v969_v18  ;;  %v975_v36 = vpack.c.bf16 %v474_v1, %v471_v33  ;;  %v963_v37 = vpack.c.bf16 %v472_v9, %v469_v34  ;;  %v644_v52 = vunpack.c.l.s4 %v1000_v51 }
 0x12f   :  { %954 = vmatprep.subr.bf16.mxu0 %v953_v28  ;;  %971 = vmatprep.subr.bf16.mxu1 %v996_v0  ;;  %v647_v55 = vshrl.u32 %v646_v53, 7  ;;  %vm668_vm13 = vcmp.lt.s32.totalorder %v646_v53, 384 }
 0x130   :  { %v645_v54 = vunpack.c.0.s8 %v644_v52 }
 0x132   :  { %956 = vmatpush1.bf16.msra.mxu0 %v955_v24  ;;  %973 = vmatpush3.bf16.msra.mxu1 %v972_v31  ;;  %v648_v56 = vsub.s32 %v645_v54, %v647_v55 }
 0x133   :  { %958 = vmatprep.subr.bf16.mxu0 %v957_v29  ;;  %974 = vmatprep.subr.bf16.mxu1 %v996_v0 }
 0x136   :  { %960 = vmatpush1.bf16.msra.mxu0 %v959_v32  ;;  %976 = vmatpush3.bf16.msra.mxu1 %v975_v36 }
 0x137   :  { %962 = vmatprep.subr.bf16.mxu0 %v961_v35 }
 0x139   :  { %867 = vmatmul.mubr.msk.f32.vlgmr.msra.gmra.mrb[6].mxu1 %vm476_vm12, %v475_v38 }
 0x13a   :  { %964 = vmatpush1.bf16.msra.mxu0 %v963_v37 }
 0x13d   :  { %738 = vmatmul.mubr.msk.f32.vlgmr.msra.gmra.mrb[6].mxu0 %vm476_vm12, %v475_v38 }
 0x20c   :  { %v617_v39 = vpop.f32.mrb[6].mxu1 }
 0x20d   :  { %v742_v40 = vmul.f32 -1.442695, %v617_v39  ;;  %v868_v41 = vpop.f32.mrb[7].mxu1 }
 0x20f   :  { %984 = vpow2.f32 %v742_v40 }
 0x210   :  { %v546_v42 = vpop.f32.mrb[6].mxu0 }
 0x211   :  { %v740_v43 = vmul.f32 -1.442695, %v546_v42  ;;  %v548_v44 = vpop.f32.mrb[7].mxu0 }
 0x212   :  { %v741_v45 = vmul.f32 -1.442695, %v548_v44 }
 0x213   :  { %986 = vpow2.f32 %v740_v43 }
 0x214   :  { %988 = vpow2.f32 %v741_v45 }
 0x219   :  { %v985_v0 = vpop.eup %984 }
 0x21a   :  { %v632_v46 = vadd.f32 1.0, %v985_v0 }
 0x21c   :  { %990 = vrcp.f32 %v632_v46 }
 0x21d   :  { %v987_v47 = vpop.eup %986 }
 0x21e   :  { %v989_v48 = vpop.eup %988  ;;  %v630_v49 = vadd.f32 1.0, %v987_v47 }
 0x21f   :  { %v631_v50 = vadd.f32 1.0, %v989_v48 }
 0x220   :  { %992 = vrcp.f32 %v630_v49 }
 0x221   :  { %994 = vrcp.f32 %v631_v50 }
 0x226   :  { %v991_v57 = vpop.eup %990 }
 0x227   :  { %v656_v61 = vrot.slane %v991_v57, %v648_v56 }
 0x22a   :  { %v993_v58 = vpop.eup %992 }
 0x22b   :  { %v995_v59 = vpop.eup %994 }
 0x22c   :  { %v642_v60 = vcombine.low %v993_v58, %v995_v59 }
 0x22e   :  { %v649_v62 = vrot.slane %v642_v60, %v648_v56 }
 0x230   :  { %v657_v63 = vcombine.low %v649_v62, %v656_v61 }
 0x232   :  { %v664_v1 = vrot.slane %v657_v63, %v648_v56 }
 0x234   :  { %670 = vst.msk [vmem:[%s1296_s4] sm:$0x7] %vm668_vm13, %v664_v1 }

</bundles_post_ra>
